<compile_context>
chip_gen: v6e
topology: v6e:2x2x1
jax: 0.10.0
libtpu: 0.0.40
codegen_flags: <defaults>
</compile_context>

<pallas_src>
import functools

import jax
import jax.numpy as jnp
import numpy as np
from jax.experimental import pallas as pl
from jax.experimental.pallas import tpu as pltpu

EPS = 1e-05
SHAPE = (3, 4, 5)          # shape from the reference script
NORMALIZED_SHAPE = (5,)    # normalize over the last dim


def _layernorm_kernel(x_ref, gamma_ref, beta_ref, o_ref, *, eps):
    # x_ref: (tile_r, H) block; gamma/beta: (1, H) f32 resident blocks.
    x = x_ref[...].astype(jnp.float32)
    gamma = gamma_ref[...]          # already f32 (cast once in the wrapper)
    beta = beta_ref[...]

    inv_h = 1.0 / float(x.shape[-1])
    # Two-pass statistics (numerically robust, compute is free vs. HBM BW):
    mean = jnp.sum(x, axis=-1, keepdims=True) * inv_h
    xc = x - mean
    var = jnp.sum(xc * xc, axis=-1, keepdims=True) * inv_h   # biased var (torch)
    inv = jax.lax.rsqrt(var + eps)                           # EUP rsqrt; multiply, not divide
    o_ref[...] = (xc * inv * gamma + beta).astype(o_ref.dtype)


def _vmem_config():
    """(vmem_limit_bytes, tile_budget_bytes) sized to the current generation."""
    phys = 64 * 1024 * 1024  # conservative default: v7x per-TC VMEM
    try:
        info = pltpu.get_tpu_info()
        phys = int(getattr(info, "vmem_capacity_bytes", phys)) or phys
    except Exception:
        pass
    limit = min(int(phys * 3 // 4), 96 * 1024 * 1024)   # 48 MiB on v7x, 96 MiB on v5e/v6e
    return limit, limit // 2


def _choose_tile_r(r, h, in_itemsize, out_itemsize, vmem_budget_bytes):
    """Largest row tile (multiple of 8) whose double-buffered in+out tiles fit the budget."""
    hp = max(128, ((h + 127) // 128) * 128)              # lanes pad to 128 in VMEM regardless
    per_row_bytes = 2 * in_itemsize * hp + 2 * out_itemsize * hp
    tile = max(8, vmem_budget_bytes // per_row_bytes)
    tile = (tile // 8) * 8
    tile = min(tile, 2048)                               # amortizes ~0.35us/step well past this
    if r > 8:
        # v7x megacore: guarantee >= 2 row blocks so "parallel" can shard across both TCs.
        half = ((r + 1) // 2 + 7) // 8 * 8
        tile = min(tile, half)
    tile = min(tile, ((r + 7) // 8) * 8)                 # never (much) larger than the data
    return max(tile, 8)


def layer_norm(x, gamma, beta, eps=EPS):
    """LayerNorm over the last axis of x (elementwise_affine=True), torch semantics."""
    orig_shape = x.shape
    H = orig_shape[-1]
    R = int(np.prod(orig_shape[:-1])) if len(orig_shape) > 1 else 1
    x2 = x.reshape(R, H)

    g2 = gamma.reshape(1, H).astype(jnp.float32)
    b2 = beta.reshape(1, H).astype(jnp.float32)

    vmem_limit, tile_budget = _vmem_config()
    out_itemsize = jnp.dtype(x.dtype).itemsize
    tile_r = _choose_tile_r(R, H, jnp.dtype(x.dtype).itemsize, out_itemsize, tile_budget)

    grid = (pl.cdiv(R, tile_r),)   # partial last block handled/masked by Pallas

    out = pl.pallas_call(
        functools.partial(_layernorm_kernel, eps=eps),
        out_shape=jax.ShapeDtypeStruct((R, H), x.dtype),
        grid=grid,
        in_specs=[
            pl.BlockSpec((tile_r, H), lambda i: (i, 0)),   # x: tiled over rows, full H
            pl.BlockSpec((1, H), lambda i: (0, 0)),        # gamma: VMEM-resident
            pl.BlockSpec((1, H), lambda i: (0, 0)),        # beta: VMEM-resident
        ],
        out_specs=pl.BlockSpec((tile_r, H), lambda i: (i, 0)),
        compiler_params=pltpu.CompilerParams(
            dimension_semantics=("parallel",),             # shard rows across TCs on v7x
            vmem_limit_bytes=vmem_limit,
        ),
    )(x2, g2, b2)

    return out.reshape(orig_shape)


if __name__ == "__main__":
    key = jax.random.PRNGKey(0)
    x = jax.random.normal(key, SHAPE, dtype=jnp.float32)

    # Deterministic parameter init mirroring the module's __init__:
    # gamma = ones(normalized_shape), beta = zeros(normalized_shape)
    gamma = jnp.ones(NORMALIZED_SHAPE, dtype=jnp.float32)
    beta = jnp.zeros(NORMALIZED_SHAPE, dtype=jnp.float32)

    out = layer_norm(x, gamma, beta, eps=EPS)
    out = jax.block_until_ready(out)

    # Pure-JAX reference (standard LayerNorm semantics, biased variance).
    mean = jnp.mean(x, axis=-1, keepdims=True)
    var = jnp.mean((x - mean) ** 2, axis=-1, keepdims=True)
    ref = (x - mean) / jnp.sqrt(var + EPS) * gamma + beta
    np.testing.assert_allclose(np.asarray(out), np.asarray(ref), rtol=1e-5, atol=1e-5)

    print("KERNEL_OK")
</pallas_src>

<mosaic_0001>
module attributes {stable_mosaic.version = 11 : i64} {
  func.func @_layernorm_kernel(%arg0: i32, %arg1: memref<8x5xf32, #tpu.memory_space<vmem>>, %arg2: memref<1x5xf32, #tpu.memory_space<vmem>>, %arg3: memref<1x5xf32, #tpu.memory_space<vmem>>, %arg4: memref<8x5xf32, #tpu.memory_space<vmem>>) attributes {dimension_semantics = [#tpu.dimension_semantics<parallel>], iteration_bounds = array<i64: 2>, scalar_prefetch = 0 : i64, scratch_operands = 0 : i64, tpu.core_type = #tpu.core_type<tc>, window_params = [{transform_indices = @transform_0, window_bounds = array<i64: 8, 5>}, {pipeline_mode = #tpu.pipeline_mode<synchronous>, transform_indices = @transform_1, window_bounds = array<i64: 1, 5>}, {pipeline_mode = #tpu.pipeline_mode<synchronous>, transform_indices = @transform_2, window_bounds = array<i64: 1, 5>}, {transform_indices = @transform_3, window_bounds = array<i64: 8, 5>}]} {
    %c0 = arith.constant 0 : index
    %c0_0 = arith.constant 0 : index
    %0 = vector.load %arg1[%c0, %c0_0] : memref<8x5xf32, #tpu.memory_space<vmem>>, vector<8x5xf32>
    %c0_1 = arith.constant 0 : index
    %c0_2 = arith.constant 0 : index
    %1 = vector.load %arg2[%c0_1, %c0_2] : memref<1x5xf32, #tpu.memory_space<vmem>>, vector<1x5xf32>
    %c0_3 = arith.constant 0 : index
    %c0_4 = arith.constant 0 : index
    %2 = vector.load %arg3[%c0_3, %c0_4] : memref<1x5xf32, #tpu.memory_space<vmem>>, vector<1x5xf32>
    %cst = arith.constant dense<0.000000e+00> : vector<8xf32>
    %3 = vector.multi_reduction <add>, %0, %cst [1] : vector<8x5xf32> to vector<8xf32>
    %4 = vector.shape_cast %3 : vector<8xf32> to vector<8x1xf32>
    %cst_5 = arith.constant 2.000000e-01 : f32
    %5 = vector.broadcast %cst_5 : f32 to vector<8x1xf32>
    %6 = arith.mulf %4, %5 : vector<8x1xf32>
    %7 = vector.broadcast %6 : vector<8x1xf32> to vector<8x5xf32>
    %8 = arith.subf %0, %7 : vector<8x5xf32>
    %9 = arith.mulf %8, %8 : vector<8x5xf32>
    %cst_6 = arith.constant dense<0.000000e+00> : vector<8xf32>
    %10 = vector.multi_reduction <add>, %9, %cst_6 [1] : vector<8x5xf32> to vector<8xf32>
    %11 = vector.shape_cast %10 : vector<8xf32> to vector<8x1xf32>
    %cst_7 = arith.constant 2.000000e-01 : f32
    %12 = vector.broadcast %cst_7 : f32 to vector<8x1xf32>
    %13 = arith.mulf %11, %12 : vector<8x1xf32>
    %cst_8 = arith.constant 9.99999974E-6 : f32
    %14 = vector.broadcast %cst_8 : f32 to vector<8x1xf32>
    %15 = arith.addf %13, %14 : vector<8x1xf32>
    %16 = math.rsqrt %15 : vector<8x1xf32>
    %17 = vector.broadcast %16 : vector<8x1xf32> to vector<8x5xf32>
    %18 = arith.mulf %8, %17 : vector<8x5xf32>
    %19 = vector.broadcast %1 : vector<1x5xf32> to vector<8x5xf32>
    %20 = arith.mulf %18, %19 : vector<8x5xf32>
    %21 = vector.broadcast %2 : vector<1x5xf32> to vector<8x5xf32>
    %22 = arith.addf %20, %21 : vector<8x5xf32>
    %c0_9 = arith.constant 0 : index
    %c0_10 = arith.constant 0 : index
    %23 = vector.load %arg4[%c0_9, %c0_10] : memref<8x5xf32, #tpu.memory_space<vmem>>, vector<8x5xf32>
    tpu.vector_store %arg4[%c0_9, %c0_10], %22 {strides = array<i32>} : memref<8x5xf32, #tpu.memory_space<vmem>>, vector<8x5xf32>,
    return
  }
  func.func @transform_0(%arg0: i32) -> (i32, i32) {
    %c0_i32 = arith.constant 0 : i32
    %c0_i32_0 = arith.constant 0 : i32
    return %arg0, %c0_i32 : i32, i32
  }
  func.func @transform_1(%arg0: i32) -> (i32, i32) {
    %c0_i32 = arith.constant 0 : i32
    %c0_i32_0 = arith.constant 0 : i32
    %c0_i32_1 = arith.constant 0 : i32
    return %c0_i32, %c0_i32_0 : i32, i32
  }
  func.func @transform_2(%arg0: i32) -> (i32, i32) {
    %c0_i32 = arith.constant 0 : i32
    %c0_i32_0 = arith.constant 0 : i32
    %c0_i32_1 = arith.constant 0 : i32
    return %c0_i32, %c0_i32_0 : i32, i32
  }
  func.func @transform_3(%arg0: i32) -> (i32, i32) {
    %c0_i32 = arith.constant 0 : i32
    %c0_i32_0 = arith.constant 0 : i32
    return %arg0, %c0_i32 : i32, i32
  }
}

</mosaic_0001>

<bundles_post_ra>
// kernel: tpu_custom_call.1
= control target key start
LH: loop header
LB: loop body
LE: loop exit
PB: predicated region body
PF: predicated region fallthrough
CT: control target
= control target key end

     0   :  { %s300_s12 = smov 0   ;;  %s326_s0 = inlined_call_operand.vmem [shape: f32[12,5], index: 0, kind: input, shape index: {}]   ;;  %s327_s1 = inlined_call_operand.vmem [shape: f32[1,5], index: 1, kind: input, shape index: {}]   ;;  %s328_s2 = inlined_call_operand.vmem [shape: f32[1,5], index: 2, kind: input, shape index: {}]   ;;  %s329_s3 = inlined_call_operand.vmem [shape: f32[12,5], index: 3, kind: output, shape index: {}]  }
   0x1 LB: > { %s251_s13 = sadd.s32 4294967295, %s278_s12   ;;  %p255_p0 = scmp.ge.s32.totalorder %s278_s12, 1  ;;  %s278_s12 = sphi %s300_s12, %s13_s12  }
   0x2   : > { %p136_p1 = scmp.lt.s32.totalorder %s278_s12, 3 }
   0x4   : > { %p137_p2 = pnand %p255_p0, %p136_p1 }
   0x5   : > { %p158_p3 = scmp.lt.s32.totalorder (!%p137_p2), %s251_s13, 1 }
   0x6   : > { %140 = sbr.rel (%p137_p2) target bundleno = 324 (0x144), region = 32 }
   0xb   : > { %s331_s13 = smov (!%p158_p3, %s251_s13), 1  ;;  %vm169_vm0 = vcmask 39936   ;;  %v258_v11 = vld [vmem:[%s327_s1] ss:$0 sm:$0xff] }
   0xc   : > { %s256_s14 = sshll.u32 %s331_s13, 3  ;;  %v259_v13 = vld [vmem:[%s328_s2] ss:$0 sm:$0xff] }
   0xd   : > { %s161_s17 = scalar_lea.vmem %s326_s0, %s256_s14  ;;  %s165_s24 = scalar_lea.vmem %s329_s3, %s256_s14 }
   0xe   : > { %v166_v0 = vld [vmem:[%s161_s17] sm:$0xff] }
   0xf   : > { %v170_v1 = vsel %vm169_vm0, %v166_v0, 0.0 }
  0x10   : > { %171 = vadd.xlane.f32.xlu0 %v170_v1 }
  0x99   : > { %v172_v2 = vpop.xlane.xlu0 %171 }
  0x9a   : > { %v173_v3 = vmul.f32 0.2, %v172_v2 }
  0x9c   : > { %v174_v4 = vsub.f32 %v166_v0, %v173_v3 }
  0x9e   : > { %v175_v5 = vmul.f32 %v174_v4, %v174_v4 }
  0xa0   : > { %v176_v6 = vsel %vm169_vm0, %v175_v5, 0.0 }
  0xa1   : > { %177 = vadd.xlane.f32.xlu0 %v176_v6 }
 0x12a   : > { %v178_v7 = vpop.xlane.xlu0 %177 }
 0x12b   : > { %v179_v8 = vmul.f32 0.2, %v178_v7 }
 0x12d   : > { %v180_v9 = vadd.f32 1e-05, %v179_v8 }
 0x12f   : > { %270 = vrsqrt.f32 %v180_v9 }
 0x13c   : > { %v271_v10 = vpop.eup %270 }
 0x13d   : > { %v182_v12 = vmul.f32 %v271_v10, %v174_v4 }
 0x13f   : > { %v189_v14 = vmul.f32 %v258_v11, %v182_v12 }
 0x141   : > { %v196_v15 = vadd.f32 %v259_v13, %v189_v14 }
 0x143   : > { %197 = vst.msk [vmem:[%s165_s24] sm:$0xff] %vm169_vm0, %v196_v15 }
 0x144 PF: > { %s13_s12 = sadd.s32 1, %s278_s12  }
 0x145   : > { %p10_p4 = scmp.ge.s32.totalorder %s13_s12, 4  }
 0x147   :  { %12 = sbr.rel (!%p10_p4) target bundleno = 1 (0x1), region = 62 }

</bundles_post_ra>
